<compile_context>
chip_gen: v5e
topology: v5e:2x2
jax: 0.10.0
libtpu: 0.0.40
codegen_flags: <defaults>
</compile_context>

<pallas_src>
import functools
import math

import jax
import jax.numpy as jnp
from jax.experimental import pallas as pl
from jax.experimental.pallas import tpu as pltpu


# ------------------------------- kernel -------------------------------------


def _gap_kernel(p_ref, o_ref, acc_ref, *, inv_n, n_total, tile_n, ragged):
    """Streaming GAP (mean over the set axis) with an f32 accumulator.

    p_ref   : (TB, TN, D) input tile                        (VMEM)
    o_ref   : (TB, 1, D)  output block, resident across k   (VMEM)
    acc_ref : (TB, 1, D)  f32 scratch accumulator           (VMEM)
    """
    k = pl.program_id(1)

    @pl.when(k == 0)
    def _init():
        acc_ref[...] = jnp.zeros_like(acc_ref)

    x = p_ref[...].astype(jnp.float32)
    if ragged:
        # The last k block may run past N: zero the out-of-range sublanes.
        limit = n_total - k * tile_n          # == TN for every non-last block
        row = jax.lax.broadcasted_iota(jnp.int32, x.shape, 1)
        x = jnp.where(row < limit, x, 0.0)
    acc_ref[...] += jnp.sum(x, axis=1, keepdims=True)

    @pl.when(k == pl.num_programs(1) - 1)
    def _finalize():
        o_ref[...] = (acc_ref[...] * inv_n).astype(o_ref.dtype)


# ------------------------------- tiling -------------------------------------


def _round_up(x, m):
    return ((x + m - 1) // m) * m


def _sublane_multiple(dtype):
    return {4: 8, 2: 16, 1: 32}.get(jnp.dtype(dtype).itemsize, 8)


def _largest_divisor_at_most(n, cap):
    cap = max(1, min(n, cap))
    for d in range(cap, 0, -1):
        if n % d == 0:
            return d
    return 1


@functools.lru_cache(maxsize=1)
def _hw_params():
    """(vmem_limit_bytes, small_input_bytes): generation-aware, safe defaults."""
    vmem_limit = 40 * 1024 * 1024          # safe on v5e/v6e (128 MiB) and v7x (64 MiB)
    small_bytes = 1 * 1024 * 1024
    try:
        info = pltpu.get_tpu_info()
        cap = None
        for name in ("vmem_capacity_bytes", "vmem_size_bytes"):
            cap = getattr(info, name, None)
            if cap:
                break
        if cap:
            if cap <= 80 * 1024 * 1024:     # v7x-class: 64 MiB per TensorCore
                vmem_limit = 44 * 1024 * 1024
                small_bytes = 2 * 1024 * 1024
            else:                           # v5e / v6e: 128 MiB physical VMEM
                vmem_limit = 48 * 1024 * 1024
                small_bytes = 1 * 1024 * 1024
    except Exception:
        pass
    return vmem_limit, small_bytes


def _choose_tiles(B, N, D, dtype, work_budget):
    """Pick (TB, TN) for the (TB, TN, D) streamed block within `work_budget`."""
    itemsize = jnp.dtype(dtype).itemsize
    sublane = _sublane_multiple(dtype)
    padded_d = _round_up(D, 128)
    # Bytes per "row" (one set element of one batch) in the padded VMEM layout:
    # double-buffered input tile plus the transient f32 cast of sub-f32 dtypes.
    bytes_per_row = padded_d * (2 * itemsize + (4 if itemsize < 4 else 0))
    max_rows = max(sublane, work_budget // bytes_per_row)
    padded_n = _round_up(N, sublane)

    if padded_n <= max_rows:
        # Whole reduction fits in one block: grow TB, but keep >= 2 blocks on
        # the "parallel" batch axis so both v7x TensorCores get work.
        tb_cap = max(1, max_rows // padded_n)
        if B >= 2:
            tb_cap = min(tb_cap, B // 2)
        return _largest_divisor_at_most(B, tb_cap), N

    # Stream the reduction axis.  TB = 1 maximizes TN (the contiguous
    # per-batch DMA run) and leaves B (>= 2) blocks on the parallel axis.
    tn = max(sublane, (max_rows // sublane) * sublane)
    return 1, min(tn, padded_n)


# ------------------------------- wrapper ------------------------------------


def gap_pooling(P, *, force_pallas=False, vmem_budget_bytes=None):
    """GAP pooling: mean over dim=1.  P: (B, N, D) -> (B, D)."""
    B, N, D = P.shape
    dtype = P.dtype
    itemsize = jnp.dtype(dtype).itemsize
    vmem_limit, small_bytes = _hw_params()

    total_bytes = int(P.size) * itemsize
    if total_bytes == 0 or (not force_pallas and total_bytes < small_bytes):
        # Tiny input: fixed pallas_call / per-step overhead dominates, and
        # XLA's fused mean is already at HBM roofline there.
        return jnp.mean(P, axis=1)

    # Lane-dense folding: for D % 128 != 0, view P as (B, N/kk, kk*D) so the
    # lane axis is a multiple of 128 (no masked vld/vst, no lane padding of
    # VMEM), then fold the kk sub-partials with one cheap XLA add at the end.
    kk = 1
    if D % 128 != 0:
        k_need = 128 // math.gcd(D, 128)
        if k_need > 1 and N % k_need == 0:
            kk = k_need
    if kk > 1:
        P_work = P.reshape(B, N // kk, kk * D)
        out_dtype = jnp.float32            # fold sub-partials in f32, cast at the end
    else:
        P_work = P
        out_dtype = dtype

    Bw, Nw, Dw = P_work.shape
    work_budget = int(vmem_budget_bytes) if vmem_budget_bytes else int(vmem_limit * 0.75)
    tb, tn = _choose_tiles(Bw, Nw, Dw, dtype, work_budget)
    ragged = (Nw % tn) != 0
    grid = (Bw // tb, pl.cdiv(Nw, tn))
    inv_n = float(1.0 / N)                 # true N (also correct for the folded view)

    kernel = functools.partial(
        _gap_kernel, inv_n=inv_n, n_total=Nw, tile_n=tn, ragged=ragged)

    cost = pl.CostEstimate(
        flops=int(B) * int(N) * int(D),
        transcendentals=0,
        bytes_accessed=total_bytes + int(Bw) * int(Dw) * jnp.dtype(out_dtype).itemsize,
    )

    out = pl.pallas_call(
        kernel,
        # Middle singleton keeps the batch block dim out of the (8, 128)
        # last-two-dims constraint, so TB can be any divisor of B (incl. 1).
        out_shape=jax.ShapeDtypeStruct((Bw, 1, Dw), out_dtype),
        grid_spec=pltpu.PrefetchScalarGridSpec(
            num_scalar_prefetch=0,
            grid=grid,
            in_specs=[pl.BlockSpec((tb, tn, Dw), lambda b, k: (b, k, 0))],
            out_specs=pl.BlockSpec((tb, 1, Dw), lambda b, k: (b, 0, 0)),
            scratch_shapes=[pltpu.VMEM((tb, 1, Dw), jnp.float32)],
        ),
        compiler_params=pltpu.CompilerParams(
            dimension_semantics=("parallel", "arbitrary"),
            vmem_limit_bytes=vmem_limit,
        ),
        cost_estimate=cost,
    )(P_work)

    out = out.reshape(Bw, Dw)
    if kk > 1:
        out = out.reshape(B, kk, D).sum(axis=1).astype(dtype)
    return out


class Pooling:
    """JAX/Pallas equivalent of the PyTorch `Pooling` module (GAP branch)."""

    def __init__(self, pooling, d_in=1, num_projections=1, num_ref_points=1):
        self.pooling = pooling
        if pooling == "GAP":
            self.num_outputs = d_in
        else:
            # TODO(synk): PSWE / PMA / FSPool are not defined in the reference source.
            raise ValueError(f"Pooling type {pooling} not implemented!")

    def __call__(self, P):
        # P: (B, N, d_in)  ->  (B, num_outputs)
        return gap_pooling(P)


if __name__ == "__main__":
    key = jax.random.PRNGKey(0)
    k1, k2, k3, k4 = jax.random.split(key, 4)

    # 1) Module-level demo at a tiny shape (small-input fallback path).
    B, N, d_in = 2, 8, 32
    P = jax.random.normal(k1, (B, N, d_in), dtype=jnp.float32)
    pool = Pooling("GAP", d_in=d_in)
    U = jax.block_until_ready(pool(P))
    assert U.shape == (B, d_in)
    assert jnp.allclose(U, jnp.mean(P, axis=1), atol=1e-5, rtol=1e-5)

    # 2) Pallas kernel: lane-dense full-reduction path (D = 128).
    B, N, D = 2, 64, 128
    P2 = jax.random.normal(k2, (B, N, D), dtype=jnp.float32)
    U2 = jax.block_until_ready(gap_pooling(P2, force_pallas=True))
    assert jnp.allclose(U2, jnp.mean(P2, axis=1), atol=1e-5, rtol=1e-5)

    # 3) Pallas kernel: D % 128 != 0 -> lane-dense fold path (kk = 4).
    B, N, D = 4, 100, 32
    P3 = jax.random.normal(k3, (B, N, D), dtype=jnp.float32)
    U3 = jax.block_until_ready(gap_pooling(P3, force_pallas=True))
    assert jnp.allclose(U3, jnp.mean(P3, axis=1), atol=1e-5, rtol=1e-5)

    # 4) Pallas kernel: streamed reduction with ragged tail mask, bf16 input
    #    (tiny VMEM budget override forces multiple k blocks at small shapes).
    B, N, D = 2, 1000, 128
    P4 = jax.random.normal(k4, (B, N, D), dtype=jnp.float32).astype(jnp.bfloat16)
    U4 = jax.block_until_ready(
        gap_pooling(P4, force_pallas=True, vmem_budget_bytes=64 * 1024))
    ref4 = jnp.mean(P4.astype(jnp.float32), axis=1)
    assert jnp.allclose(U4.astype(jnp.float32), ref4, atol=1e-2, rtol=1e-2)

    print("KERNEL_OK")
</pallas_src>

<mosaic_0001>
module attributes {stable_mosaic.version = 11 : i64} {
  func.func @_gap_kernel(%arg0: i32, %arg1: i32, %arg2: memref<1x64x128xf32, #tpu.memory_space<vmem>>, %arg3: memref<1x1x128xf32, #tpu.memory_space<vmem>>, %arg4: memref<1x1x128xf32, #tpu.memory_space<vmem>>) attributes {dimension_semantics = [#tpu.dimension_semantics<parallel>, #tpu.dimension_semantics<arbitrary>], iteration_bounds = array<i64: 2, 1>, scalar_prefetch = 0 : i64, scratch_operands = 1 : i64, tpu.core_type = #tpu.core_type<tc>, window_params = [{transform_indices = @transform_0, window_bounds = array<i64: 1, 64, 128>}, {transform_indices = @transform_1, window_bounds = array<i64: 1, 1, 128>}]} {
    %c0_i32 = arith.constant 0 : i32
    %0 = arith.cmpi eq, %arg1, %c0_i32 : i32
    %1 = arith.extui %0 : i1 to i32
    %c0_i32_0 = arith.constant 0 : i32
    %2 = arith.cmpi ne, %1, %c0_i32_0 : i32
    scf.if %2 {
      %cst_11 = arith.constant 0.000000e+00 : f32
      %12 = vector.broadcast %cst_11 : f32 to vector<1x1x128xf32>
      %c0_12 = arith.constant 0 : index
      %c0_13 = arith.constant 0 : index
      %c0_14 = arith.constant 0 : index
      %13 = vector.load %arg4[%c0_12, %c0_13, %c0_14] : memref<1x1x128xf32, #tpu.memory_space<vmem>>, vector<1x1x128xf32>
      tpu.vector_store %arg4[%c0_12, %c0_13, %c0_14], %12 {strides = array<i32>} : memref<1x1x128xf32, #tpu.memory_space<vmem>>, vector<1x1x128xf32>,
    } else {
    }
    %c0 = arith.constant 0 : index
    %c0_1 = arith.constant 0 : index
    %c0_2 = arith.constant 0 : index
    %3 = vector.load %arg2[%c0, %c0_1, %c0_2] : memref<1x64x128xf32, #tpu.memory_space<vmem>>, vector<1x64x128xf32>
    %c0_3 = arith.constant 0 : index
    %c0_4 = arith.constant 0 : index
    %c0_5 = arith.constant 0 : index
    %4 = vector.load %arg4[%c0_3, %c0_4, %c0_5] : memref<1x1x128xf32, #tpu.memory_space<vmem>>, vector<1x1x128xf32>
    %cst = arith.constant dense<0.000000e+00> : vector<1x128xf32>
    %5 = vector.multi_reduction <add>, %3, %cst [1] : vector<1x64x128xf32> to vector<1x128xf32>
    %6 = vector.shape_cast %5 : vector<1x128xf32> to vector<1x1x128xf32>
    %7 = arith.addf %4, %6 : vector<1x1x128xf32>
    %c0_6 = arith.constant 0 : index
    %c0_7 = arith.constant 0 : index
    %c0_8 = arith.constant 0 : index
    %8 = vector.load %arg4[%c0_6, %c0_7, %c0_8] : memref<1x1x128xf32, #tpu.memory_space<vmem>>, vector<1x1x128xf32>
    tpu.vector_store %arg4[%c0_6, %c0_7, %c0_8], %7 {strides = array<i32>} : memref<1x1x128xf32, #tpu.memory_space<vmem>>, vector<1x1x128xf32>,
    %c0_i32_9 = arith.constant 0 : i32
    %9 = arith.cmpi eq, %arg1, %c0_i32_9 : i32
    %10 = arith.extui %9 : i1 to i32
    %c0_i32_10 = arith.constant 0 : i32
    %11 = arith.cmpi ne, %10, %c0_i32_10 : i32
    scf.if %11 {
      %c0_11 = arith.constant 0 : index
      %c0_12 = arith.constant 0 : index
      %c0_13 = arith.constant 0 : index
      %12 = vector.load %arg4[%c0_11, %c0_12, %c0_13] : memref<1x1x128xf32, #tpu.memory_space<vmem>>, vector<1x1x128xf32>
      %cst_14 = arith.constant 1.562500e-02 : f32
      %13 = vector.broadcast %cst_14 : f32 to vector<1x1x128xf32>
      %14 = arith.mulf %12, %13 : vector<1x1x128xf32>
      %c0_15 = arith.constant 0 : index
      %c0_16 = arith.constant 0 : index
      %c0_17 = arith.constant 0 : index
      %15 = vector.load %arg3[%c0_15, %c0_16, %c0_17] : memref<1x1x128xf32, #tpu.memory_space<vmem>>, vector<1x1x128xf32>
      tpu.vector_store %arg3[%c0_15, %c0_16, %c0_17], %14 {strides = array<i32>} : memref<1x1x128xf32, #tpu.memory_space<vmem>>, vector<1x1x128xf32>,
    } else {
    }
    return
  }
  func.func @transform_0(%arg0: i32, %arg1: i32) -> (i32, i32, i32) {
    %c0_i32 = arith.constant 0 : i32
    %c0_i32_0 = arith.constant 0 : i32
    return %arg0, %arg1, %c0_i32 : i32, i32, i32
  }
  func.func @transform_1(%arg0: i32, %arg1: i32) -> (i32, i32, i32) {
    %c0_i32 = arith.constant 0 : i32
    %c0_i32_0 = arith.constant 0 : i32
    %c0_i32_1 = arith.constant 0 : i32
    return %arg0, %c0_i32, %c0_i32_0 : i32, i32, i32
  }
}

</mosaic_0001>

<bundles_post_ra>
// kernel: tpu_custom_call.1
= control target key start
LH: loop header
LB: loop body
LE: loop exit
PB: predicated region body
PF: predicated region fallthrough
CT: control target
= control target key end

     0   :  { %6 = vsyncpa [#allocation4], 0  ;;  %s603_s0 = inlined_call_operand.hbm [shape: f32[2,64,128], index: 0, kind: input, shape index: {}]   ;;  %s604_s1 = inlined_call_operand.hbm [shape: f32[2,1,128], index: 1, kind: output, shape index: {}]  }
   0x1   :  { %8 = vsyncpa [#allocation4 + $0x1], 0 }
   0x2   :  { %9 = vsyncpa [#allocation5], 0 }
   0x3   :  { %11 = vsyncpa [#allocation5 + $0x1], 0  ;;  %s482_s6 = smov 0   ;;  %s484_s7 = smov 0  }
   0x4   :  { %s486_s8 = smov 0   ;;  %s488_s9 = smov 0  }
   0x5   :  { %s490_s10 = smov 0   ;;  %s492_s11 = smov 0  }
   0x6 LB: > { %s278_s12 = sadd.s32 4294967295, %s467_s11   ;;  %s279_s13 = sadd.s32 4294967294, %s467_s11   ;;  %s467_s11 = sphi %s492_s11, %s17_s11   ;;  %s463_s10 = sphi %s490_s10, %s613_s10   ;;  %s459_s9 = sphi %s488_s9, %s612_s9   ;;  %s455_s8 = sphi %s486_s8, %s611_s8   ;;  %s451_s7 = sphi %s484_s7, %s610_s7   ;;  %s447_s6 = sphi %s482_s6, %s609_s6  }
   0x7   : > { %s29_s14 = sadd.s32 1, %s463_s10  ;;  %s38_s15 = sadd.s32 1, %s455_s8 }
   0x8   : > { %p31_p0 = scmp.ge.s32.totalorder %s29_s14, 2  ;;  %p45_p1 = scmp.ne.s32.totalorder %s455_s8, %s451_s7 }
   0x9   : > { %p46_p2 = scmp.eq.s32.totalorder %s467_s11, 0  ;;  %p51_p3 = scmp.ne.s32.totalorder %s451_s7, %s447_s6 }
   0xa   : > { %s615_s14 = smov (%p31_p0, %s29_s14), 0  ;;  %p52_p5 = scmp.eq.s32.totalorder %s278_s12, 0 }
   0xb   : > { %p523_p4 = por %p46_p2, %p45_p1  ;;  %s33_s17 = ssub.s32 %s463_s10, %s615_s14 }
   0xc   : > { %p75_p6 = scmp.eq.s32.totalorder %s278_s12, 1  ;;  %p36_p7 = scmp.eq.s32.totalorder %s33_s17, 0 }
   0xd   : > { %p529_p8 = por %p52_p5, %p51_p3  ;;  %p81_p10 = scmp.eq.s32.totalorder %s279_s13, 1 }
   0xe   : > { %p533_p9 = por %p75_p6, %p45_p1  ;;  %p281_p12 = scmp.ge.s32.totalorder %s467_s11, 2 }
   0xf   : > { %s538_s20 = scalar_select %p36_p7, %s455_s8, %s38_s15  }
  0x10   : > { %p540_p11 = por %p81_p10, %p51_p3  ;;  %p302_p13 = scmp.lt.s32.totalorder %s467_s11, 2 }
  0x11   : > { %s101_s22 = sand.u32 1, %s455_s8   ;;  %s289_s24 = sshll.u32 %s463_s10, 6 }
  0x12   : > { %s282_s23 = sshll.u32 %s101_s22, 6  ;;  %s112_s27 = scalar_lea.hbm %s603_s0, %s289_s24 }
  0x13   : > { %s105_s28 = scalar_lea.vmem [#allocation3], %s282_s23  ;;  %s113_s30 = sshll.u32 %s112_s27, 4  ;;  %s114_s30 = int_to_ptr.hbm [resolvable:$true] %s113_s30 }
  0x14   : > { %s115_s29 = sshll.u32 %s105_s28, 4  ;;  %p295_p0 = pnand %p302_p13, %p523_p4  ;;  %s116_s29 = int_to_ptr.vmem [resolvable:$true] %s115_s29 }
  0x15   : > { %p285_p1 = scmp.ge.s32.totalorder %s467_s11, 1  ;;  %s102_s2 = scalar_lea.sflag [#allocation4], %s101_s22 }
  0x16   : > { %s469_s3 = smov 128   ;;  %s470_s4 = smov 8  }
  0x17   : > { %297 = dma.hbm_to_vmem [thread:$0]  (!%p295_p0), %s114_s30, 1024, %s116_s29, %s102_s2, %s469_s3, %s469_s3, %s470_s4  }
  0x18   : > { %p123_p2 = scmp.lt.s32.totalorder %s467_s11, 3 }
  0x1a   : > { %p124_p3 = pnand %p285_p1, %p123_p2 }
  0x1b   : > { %s556_s5 = sand.u32 (!%p124_p3), 1, %s451_s7  }
  0x1c   : > { %127 = sbr.rel (%p124_p3) target bundleno = 76 (0x4c), region = 24  ;;  %s286_s12 = sshll.u32 (!%p124_p3), %s556_s5, 6 }
  0x1d   : > { %s130_s13 = scalar_lea.sflag (!%p124_p3), [#allocation4], %s556_s5  ;;  %s133_s15 = scalar_lea.vmem (!%p124_p3), [#allocation3], %s286_s12 }
  0x21   : > { %438 = dma.done.wait (%p529_p8), %s130_s13, 1024  }
  0x22   : > { %440 = vsyncadd (%p529_p8), %s130_s13, 4294966272  ;;  %v471_v0 = vmov 0.0   ;;  %v158_v1 = vld [vmem:[%s133_s15] sm:$0xff]  ;;  %v159_v2 = vld [vmem:[%s133_s15 + $0x8] sm:$0xff]  ;;  %s197_s18 = scalar_lea.hbm %s604_s1, %s459_s9  ;;  %s151_s22 = scalar_lea.vmem [#allocation6], %s556_s5 }
  0x23   : > { %157 = vst [vmem:[#allocation2] sm:$0x1] %v471_v0  ;;  %v160_v3 = vld [vmem:[%s133_s15 + $0x10] sm:$0xff]  ;;  %v167_v4 = vadd.f32 %v159_v2, %v158_v1  ;;  %v161_v5 = vld [vmem:[%s133_s15 + $0x18] sm:$0xff]  ;;  %v162_v7 = vld [vmem:[%s133_s15 + $0x20] sm:$0xff]  ;;  %s199_s23 = sshll.u32 %s151_s22, 4  ;;  %s200_s23 = int_to_ptr.vmem [resolvable:$true] %s199_s23 }
  0x24   : > { %v163_v9 = vld [vmem:[%s133_s15 + $0x28] sm:$0xff]  ;;  %v164_v11 = vld [vmem:[%s133_s15 + $0x30] sm:$0xff]  ;;  %v165_v13 = vld [vmem:[%s133_s15 + $0x38] sm:$0xff]  ;;  %s201_s24 = sshll.u32 %s197_s18, 4  ;;  %s189_s25 = scalar_lea.sflag [#allocation5], %s556_s5  ;;  %s202_s24 = int_to_ptr.hbm [resolvable:$true] %s201_s24 }
  0x25   : > { %v168_v6 = vadd.f32 %v167_v4, %v160_v3  ;;  %s399_s26 = sshra.s32 %s202_s24, 4  ;;  %s405_s9 = scalar_lea.hbm %s604_s1, 2  ;;  %s400_s26 = int_to_ptr.hbm [resolvable:$true] %s399_s26 }
  0x26   : > { %s401_s27 = scalar_lea.hbm %s400_s26, 1  ;;  %p406_p7 = scmp.lt.s32.totalorder %s400_s26, %s604_s1 }
  0x27   : > { %v169_v8 = vadd.f32 %v168_v6, %v161_v5  ;;  %p402_p4 = scmp.ne.s32.totalorder %s400_s26, %s401_s27  ;;  %p407_p8 = scmp.lt.s32.totalorder %s405_s9, %s401_s27 }
  0x29   : > { %v170_v10 = vadd.f32 %v169_v8, %v162_v7  ;;  %p403_p5 = pnand %p402_p4, %p533_p9  ;;  %p408_p10 = por %p407_p8, %p406_p7 }
  0x2a   : > { %v166_v21 = vld [vmem:[#allocation2] sm:$0x1] }
  0x2b   : > { %v171_v12 = vadd.f32 %v170_v10, %v163_v9  ;;  %p404_p6 = pneg %p403_p5 }
  0x2d   : > { %v172_v14 = vadd.f32 %v171_v12, %v164_v11  ;;  %p409_p13 = pnand %p408_p10, %p404_p6 }
  0x2f   : > { %v173_v15 = vadd.f32 %v172_v14, %v165_v13 }
  0x31   : > { %v174_v16 = vrot.slane %v173_v15, 4 }
  0x33   : > { %v175_v17 = vadd.f32 %v174_v16, %v173_v15 }
  0x35   : > { %v176_v18 = vrot.slane %v175_v17, 2 }
  0x37   : > { %v177_v19 = vadd.f32 %v176_v18, %v175_v17 }
  0x39   : > { %v178_v20 = vrot.slane %v177_v19, 1 }
  0x3b   : > { %v179_v22 = vadd.f32 %v178_v20, %v177_v19 }
  0x3d   : > { %v180_v23 = vadd.f32 %v179_v22, %v166_v21 }
  0x3f   : > { %181 = vst [vmem:[#allocation2] sm:$0x1] %v180_v23 }
  0x46   : > { %v185_v24 = vld [vmem:[#allocation2] sm:$0x1] }
  0x47   : > { %v186_v25 = vmul.f32 0.015625, %v185_v24 }
  0x49   : > { %187 = vst [vmem:[%s151_s22] sm:$0x1] %v186_v25 }
  0x4a   : > { %412 = shalt.err (!%p409_p13)
}
  0x4b   : > { %292 = dma.vmem_to_hbm [thread:$0]  (%p533_p9), %s200_s23, 16, %s202_s24, %s189_s25  }
  0x4c PF: > { %s213_s3 = sand.u32 1, %s447_s6   ;;  %p299_p0 = pnand %p281_p12, %p540_p11 }
  0x4d   : > { %s214_s4 = scalar_lea.sflag [#allocation5], %s213_s3 }
  0x4e   : > { %p300_p1 = pneg %p299_p0 }
  0x50   : > { %442 = dma.done.wait (%p300_p1), %s214_s4, 16  }
  0x51   : > { %444 = vsyncadd (%p300_p1), %s214_s4, 4294967280  ;;  %s17_s11 = sadd.s32 1, %s467_s11   ;;  %s609_s6 = smov %s451_s7 }
  0x52   : > { %p14_p2 = scmp.ge.s32.totalorder %s17_s11, 4   ;;  %s610_s7 = smov %s455_s8 }
  0x53   : > { %s611_s8 = smov %s538_s20  ;;  %s612_s9 = smov %s463_s10 }
  0x54   : > { %s613_s10 = smov %s615_s14  ;;  %16 = sbr.rel (!%p14_p2) target bundleno = 6 (0x6), region = 77 }
  0x59   :  { %219 = vsyncpa [#allocation4], 1 }
  0x5a   :  { %221 = vsyncpa [#allocation4 + $0x1], 1 }
  0x5b   :  { %222 = vsyncpa [#allocation5], 1 }
  0x5c   :  { %224 = vsyncpa [#allocation5 + $0x1], 1 }

</bundles_post_ra>
